<compile_context>
chip_gen: v6e
topology: v6e:2x2x1
jax: 0.10.0
libtpu: 0.0.40
codegen_flags: <defaults>
</compile_context>

<pallas_src>
import functools

import jax
import jax.numpy as jnp
from jax.experimental import pallas as pl
from jax.experimental.pallas import tpu as pltpu


def glu_kernel(x_ref, wa_ref, wg_ref, ba_ref, bg_ref, o_ref):
    # Two lane-aligned MXU matmuls (f32 accumulation), f32 epilogue on the VPU/EUP.
    x = x_ref[...]
    a = jnp.dot(x, wa_ref[...], preferred_element_type=jnp.float32) + ba_ref[...]
    g = jnp.dot(x, wg_ref[...], preferred_element_type=jnp.float32) + bg_ref[...]
    o_ref[...] = (a * jax.nn.sigmoid(g)).astype(o_ref.dtype)


def prepare_glu_params(w, b, *, compute_dtype=None):
    """One-time param prep (do NOT call per forward).

    w: (2*hidden, input_dim) PyTorch Linear layout; b: (2*hidden,).
    Returns (wa, wg, ba, bg) with wa/wg of shape (input_dim, hidden) and
    ba/bg of shape (1, hidden) in f32 (bias add stays in f32).
    """
    two_h = w.shape[0]
    hidden = two_h // 2
    w_t = jnp.transpose(w)                       # (input_dim, 2*hidden), done once
    wa, wg = w_t[:, :hidden], w_t[:, hidden:]
    if compute_dtype is not None:
        wa = wa.astype(compute_dtype)
        wg = wg.astype(compute_dtype)
    ba = b[:hidden].reshape(1, hidden).astype(jnp.float32)
    bg = b[hidden:].reshape(1, hidden).astype(jnp.float32)
    return wa, wg, ba, bg


@functools.partial(jax.jit, static_argnames=("tile_m", "compute_dtype"))
def glu_forward(x, wa, wg, ba, bg, *, tile_m=256, compute_dtype=None):
    """x: (..., input_dim); wa/wg: (input_dim, hidden); ba/bg: (1, hidden)."""
    input_dim = x.shape[-1]
    hidden = wa.shape[1]
    out_dtype = x.dtype
    lead_shape = x.shape[:-1]

    x2d = x.reshape(-1, input_dim)
    M = x2d.shape[0]

    # Clamp the row tile for small problems (single grid step), keep it a multiple of 8.
    tile_m = max(8, min(tile_m, pl.cdiv(M, 8) * 8))
    M_pad = pl.cdiv(M, tile_m) * tile_m
    if M_pad != M:
        x2d = jnp.pad(x2d, ((0, M_pad - M), (0, 0)))
    if compute_dtype is not None:
        x2d = x2d.astype(compute_dtype)

    grid_m = M_pad // tile_m

    out2d = pl.pallas_call(
        glu_kernel,
        out_shape=jax.ShapeDtypeStruct((M_pad, hidden), out_dtype),
        grid_spec=pltpu.PrefetchScalarGridSpec(
            num_scalar_prefetch=0,
            grid=(grid_m,),
            in_specs=[
                pl.BlockSpec((tile_m, input_dim), lambda i: (i, 0)),
                pl.BlockSpec((input_dim, hidden), lambda i: (0, 0)),
                pl.BlockSpec((input_dim, hidden), lambda i: (0, 0)),
                pl.BlockSpec((1, hidden), lambda i: (0, 0)),
                pl.BlockSpec((1, hidden), lambda i: (0, 0)),
            ],
            out_specs=pl.BlockSpec((tile_m, hidden), lambda i: (i, 0)),
        ),
        compiler_params=pltpu.CompilerParams(
            dimension_semantics=("parallel",),
            vmem_limit_bytes=32 * 1024 * 1024,
        ),
    )(x2d, wa, wg, ba, bg)

    out2d = out2d[:M]
    return out2d.reshape(*lead_shape, hidden)


if __name__ == "__main__":
    # GLU(input_dim=32, hidden_units=16, dropout_rate=None, time_distributed=True)
    batch, seq, input_dim, hidden = 2, 8, 32, 16
    # TODO(synk): dropout is nn.Identity here (dropout_rate=None / eval mode), so omitted.
    # NOTE: demo output last dim (hidden=16) is < 128 lanes; for production TFT sizes use
    # hidden as a multiple of 128 (or fold rows) to get unmasked lane-dense stores.

    key = jax.random.PRNGKey(0)
    kx, kw, kb = jax.random.split(key, 3)

    x = jax.random.normal(kx, (batch, seq, input_dim), dtype=jnp.float32)
    # Deterministic Linear params (PyTorch layout: weight (out_features, in_features)).
    bound = 1.0 / (input_dim ** 0.5)
    w = jax.random.uniform(kw, (2 * hidden, input_dim), minval=-bound, maxval=bound,
                           dtype=jnp.float32)
    b = jax.random.uniform(kb, (2 * hidden,), minval=-bound, maxval=bound,
                           dtype=jnp.float32)

    # One-time param prep (transpose + split), outside the hot path.
    wa, wg, ba, bg = prepare_glu_params(w, b)

    out = glu_forward(x, wa, wg, ba, bg, tile_m=256)
    jax.block_until_ready(out)

    # Reference check in plain JAX (same math as PyTorch forward).
    y_ref = x @ w.T + b
    a_ref, g_ref = y_ref[..., :hidden], y_ref[..., hidden:]
    ref = a_ref * jax.nn.sigmoid(g_ref)
    assert out.shape == (batch, seq, hidden)
    assert jnp.allclose(out, ref, atol=1e-5, rtol=1e-5)

    print("KERNEL_OK")
</pallas_src>

<mosaic_0001>
module attributes {stable_mosaic.version = 11 : i64} {
  func.func @glu_kernel(%arg0: i32, %arg1: memref<16x32xf32, #tpu.memory_space<vmem>>, %arg2: memref<32x16xf32, #tpu.memory_space<vmem>>, %arg3: memref<32x16xf32, #tpu.memory_space<vmem>>, %arg4: memref<1x16xf32, #tpu.memory_space<vmem>>, %arg5: memref<1x16xf32, #tpu.memory_space<vmem>>, %arg6: memref<16x16xf32, #tpu.memory_space<vmem>>) attributes {dimension_semantics = [#tpu.dimension_semantics<parallel>], iteration_bounds = array<i64: 1>, scalar_prefetch = 0 : i64, scratch_operands = 0 : i64, tpu.core_type = #tpu.core_type<tc>, window_params = [{transform_indices = @transform_0, window_bounds = array<i64: 16, 32>}, {pipeline_mode = #tpu.pipeline_mode<synchronous>, transform_indices = @transform_1, window_bounds = array<i64: 32, 16>}, {pipeline_mode = #tpu.pipeline_mode<synchronous>, transform_indices = @transform_2, window_bounds = array<i64: 32, 16>}, {pipeline_mode = #tpu.pipeline_mode<synchronous>, transform_indices = @transform_3, window_bounds = array<i64: 1, 16>}, {pipeline_mode = #tpu.pipeline_mode<synchronous>, transform_indices = @transform_4, window_bounds = array<i64: 1, 16>}, {transform_indices = @transform_5, window_bounds = array<i64: 16, 16>}]} {
    %c0 = arith.constant 0 : index
    %c0_0 = arith.constant 0 : index
    %0 = vector.load %arg1[%c0, %c0_0] : memref<16x32xf32, #tpu.memory_space<vmem>>, vector<16x32xf32>
    %c0_1 = arith.constant 0 : index
    %c0_2 = arith.constant 0 : index
    %1 = vector.load %arg2[%c0_1, %c0_2] : memref<32x16xf32, #tpu.memory_space<vmem>>, vector<32x16xf32>
    %cst = arith.constant dense<0.000000e+00> : vector<16x16xf32>
    %2 = tpu.matmul %0, %1, %cst {dimension_numbers = #tpu.dot_dimension_numbers<[1], [0], [0], [1], [0, 0, 1, 1], [], []>} : vector<16x32xf32>, vector<32x16xf32>, vector<16x16xf32> -> vector<16x16xf32>
    %c0_3 = arith.constant 0 : index
    %c0_4 = arith.constant 0 : index
    %3 = vector.load %arg4[%c0_3, %c0_4] : memref<1x16xf32, #tpu.memory_space<vmem>>, vector<1x16xf32>
    %4 = vector.broadcast %3 : vector<1x16xf32> to vector<16x16xf32>
    %5 = arith.addf %2, %4 : vector<16x16xf32>
    %c0_5 = arith.constant 0 : index
    %c0_6 = arith.constant 0 : index
    %6 = vector.load %arg3[%c0_5, %c0_6] : memref<32x16xf32, #tpu.memory_space<vmem>>, vector<32x16xf32>
    %cst_7 = arith.constant dense<0.000000e+00> : vector<16x16xf32>
    %7 = tpu.matmul %0, %6, %cst_7 {dimension_numbers = #tpu.dot_dimension_numbers<[1], [0], [0], [1], [0, 0, 1, 1], [], []>} : vector<16x32xf32>, vector<32x16xf32>, vector<16x16xf32> -> vector<16x16xf32>
    %c0_8 = arith.constant 0 : index
    %c0_9 = arith.constant 0 : index
    %8 = vector.load %arg5[%c0_8, %c0_9] : memref<1x16xf32, #tpu.memory_space<vmem>>, vector<1x16xf32>
    %9 = vector.broadcast %8 : vector<1x16xf32> to vector<16x16xf32>
    %10 = arith.addf %7, %9 : vector<16x16xf32>
    %11 = arith.negf %10 : vector<16x16xf32>
    %12 = math.exp %11 : vector<16x16xf32>
    %cst_10 = arith.constant 1.000000e+00 : f32
    %13 = vector.broadcast %cst_10 : f32 to vector<16x16xf32>
    %14 = arith.addf %13, %12 : vector<16x16xf32>
    %15 = arith.divf %13, %14 : vector<16x16xf32>
    %16 = arith.mulf %5, %15 : vector<16x16xf32>
    %c0_11 = arith.constant 0 : index
    %c0_12 = arith.constant 0 : index
    %17 = vector.load %arg6[%c0_11, %c0_12] : memref<16x16xf32, #tpu.memory_space<vmem>>, vector<16x16xf32>
    tpu.vector_store %arg6[%c0_11, %c0_12], %16 {strides = array<i32>} : memref<16x16xf32, #tpu.memory_space<vmem>>, vector<16x16xf32>,
    return
  }
  func.func @transform_0(%arg0: i32) -> (i32, i32) {
    %c0_i32 = arith.constant 0 : i32
    %c0_i32_0 = arith.constant 0 : i32
    return %arg0, %c0_i32 : i32, i32
  }
  func.func @transform_1(%arg0: i32) -> (i32, i32) {
    %c0_i32 = arith.constant 0 : i32
    %c0_i32_0 = arith.constant 0 : i32
    %c0_i32_1 = arith.constant 0 : i32
    return %c0_i32, %c0_i32_0 : i32, i32
  }
  func.func @transform_2(%arg0: i32) -> (i32, i32) {
    %c0_i32 = arith.constant 0 : i32
    %c0_i32_0 = arith.constant 0 : i32
    %c0_i32_1 = arith.constant 0 : i32
    return %c0_i32, %c0_i32_0 : i32, i32
  }
  func.func @transform_3(%arg0: i32) -> (i32, i32) {
    %c0_i32 = arith.constant 0 : i32
    %c0_i32_0 = arith.constant 0 : i32
    %c0_i32_1 = arith.constant 0 : i32
    return %c0_i32, %c0_i32_0 : i32, i32
  }
  func.func @transform_4(%arg0: i32) -> (i32, i32) {
    %c0_i32 = arith.constant 0 : i32
    %c0_i32_0 = arith.constant 0 : i32
    %c0_i32_1 = arith.constant 0 : i32
    return %c0_i32, %c0_i32_0 : i32, i32
  }
  func.func @transform_5(%arg0: i32) -> (i32, i32) {
    %c0_i32 = arith.constant 0 : i32
    %c0_i32_0 = arith.constant 0 : i32
    return %arg0, %c0_i32 : i32, i32
  }
}

</mosaic_0001>

<bundles_post_ra>
// kernel: glu_forward.1
= control target key start
LH: loop header
LB: loop body
LE: loop exit
PB: predicated region body
PF: predicated region fallthrough
CT: control target
= control target key end

     0   :  { %vm34_vm0 = vcmask 261120   ;;  %s386_s0 = inlined_call_operand.vmem [shape: f32[16,32], index: 0, kind: input, shape index: {}]   ;;  %s387_s1 = inlined_call_operand.vmem [shape: f32[32,16], index: 1, kind: input, shape index: {}]   ;;  %s388_s2 = inlined_call_operand.vmem [shape: f32[32,16], index: 2, kind: input, shape index: {}]   ;;  %s389_s3 = inlined_call_operand.vmem [shape: f32[1,16], index: 3, kind: input, shape index: {}]   ;;  %s390_s4 = inlined_call_operand.vmem [shape: f32[1,16], index: 4, kind: input, shape index: {}]   ;;  %s391_s5 = inlined_call_operand.hbm [shape: f32[16,16], index: 5, kind: output, shape index: {}]  }
   0x1   :  { %v119_v0 = vld [vmem:[%s388_s2 + $0x18] sm:$0xff]  ;;  %v118_v1 = vld [vmem:[%s388_s2 + $0x10] sm:$0xff]  ;;  %v21_v2 = vld [vmem:[%s386_s0] sm:$0xff] }
   0x2   :  { %266 = vmatprep.subr.mxu1 %v119_v0  ;;  %v117_v3 = vld [vmem:[%s388_s2 + $0x8] sm:$0xff]  ;;  %274 = vmatprep.mubr.msk.f32.mxu1 %vm34_vm0, %v21_v2  ;;  %v26_v4 = vld [vmem:[%s387_s1 + $0x18] sm:$0xff]  ;;  %v25_v5 = vld [vmem:[%s387_s1 + $0x10] sm:$0xff] }
   0x3   :  { %267 = vmatpush3.msra.mxu1 %v119_v0  ;;  %255 = vmatprep.subr.mxu0 %v26_v4 }
   0x4   :  { %268 = vmatprep.subr.mxu1 %v118_v1 }
   0x5   :  { %10 = vsyncpa [#allocation3], 0  ;;  %269 = vmatpush3.msra.mxu1 %v118_v1  ;;  %v116_v6 = vld [vmem:[%s388_s2] sm:$0xff]  ;;  %256 = vmatpush3.msra.mxu0 %v26_v4  ;;  %v24_v7 = vld [vmem:[%s387_s1 + $0x8] sm:$0xff]  ;;  %vm216_vm1 = vcmask 130048  }
   0x6   :  { %270 = vmatprep.subr.mxu1 %v117_v3  ;;  %257 = vmatprep.subr.mxu0 %v25_v5  ;;  %v22_v8 = vld [vmem:[%s386_s0 + $0x8] sm:$0xff]  ;;  %v23_v9 = vld [vmem:[%s387_s1] sm:$0xff] }
   0x7   :  { %271 = vmatpush3.msra.mxu1 %v117_v3  ;;  %258 = vmatpush3.msra.mxu0 %v25_v5  ;;  %v238_v10 = vld [vmem:[%s390_s4] ss:$0 sm:$0xff]  ;;  %s310_s4 = smov [#allocation2]  }
   0x8   :  { %272 = vmatprep.subr.mxu1 %v116_v6  ;;  %259 = vmatprep.subr.mxu0 %v24_v7  ;;  %v235_v22 = vld [vmem:[%s389_s3] ss:$0 sm:$0xff]  ;;  %s224_s14 = sshll.u32 %s310_s4, 4  ;;  %s225_s14 = int_to_ptr.vmem [resolvable:$true] %s224_s14 }
   0x9   :  { %273 = vmatpush3.msra.mxu1 %v116_v6  ;;  %260 = vmatpush3.msra.mxu0 %v24_v7  ;;  %s288_s15 = scalar_lea.vmem %s225_s14, 256  ;;  %p293_p1 = scmp.lt.s32.totalorder %s225_s14, %s225_s14 }
   0xa   :  { %275 = vmatmul.mubr.msk.f32.vlgmr.msra.gmra.mxu1 %vm34_vm0, %v22_v8  ;;  %261 = vmatprep.subr.mxu0 %v23_v9  ;;  %p289_p0 = scmp.ne.s32.totalorder %s225_s14, %s288_s15  ;;  %p294_p2 = scmp.lt.s32.totalorder %s288_s15, %s288_s15 }
   0xb   :  { %262 = vmatpush3.msra.mxu0 %v23_v9  ;;  %263 = vmatprep.mubr.msk.f32.mxu0 %vm34_vm0, %v21_v2 }
   0xc   :  { %264 = vmatmul.mubr.msk.f32.vlgmr.msra.gmra.mxu0 %vm34_vm0, %v22_v8  ;;  %p295_p3 = por %p294_p2, %p293_p1 }
   0xe   :  { %p296_p4 = pnand %p295_p3, %p289_p0 }
  0xca   :  { %v276_v11 = vpop.f32.mrf.mxu1 }
  0xcb   :  { %v199_v12 = vadd.f32 %v276_v11, %v238_v10 }
  0xcc   :  { %v193_v13 = vpop.f32.mrf.mxu1  ;;  %v265_v21 = vpop.f32.mrf.mxu0 }
  0xcd   :  { %v242_v14 = vmul.f32 -1.442695, %v199_v12  ;;  %v194_v15 = vadd.f32 %v238_v10, %v193_v13  ;;  %v113_v23 = vadd.f32 %v265_v21, %v235_v22 }
  0xce   :  { %v107_v24 = vpop.f32.mrf.mxu0 }
  0xcf   :  { %280 = vpow2.f32 %v242_v14  ;;  %v241_v16 = vmul.f32 -1.442695, %v194_v15  ;;  %v108_v27 = vadd.f32 %v235_v22, %v107_v24 }
  0xd1   :  { %282 = vpow2.f32 %v241_v16 }
  0xdc   :  { %v281_v17 = vpop.eup %280 }
  0xdd   :  { %v209_v18 = vadd.f32 1.0, %v281_v17 }
  0xde   :  { %v283_v19 = vpop.eup %282 }
  0xdf   :  { %284 = vrcp.f32 %v209_v18  ;;  %v208_v20 = vadd.f32 1.0, %v283_v19 }
  0xe1   :  { %286 = vrcp.f32 %v208_v20 }
  0xec   :  { %v285_v25 = vpop.eup %284 }
  0xed   :  { %v215_v26 = vmul.f32 %v285_v25, %v113_v23 }
  0xee   :  { %v287_v28 = vpop.eup %286 }
  0xef   :  { %218 = vst.msk [vmem:[#allocation2 + $0x8] sm:$0xff] %vm216_vm1, %v215_v26  ;;  %v214_v29 = vmul.f32 %v287_v28, %v108_v27 }
  0xf1   :  { %217 = vst.msk [vmem:[#allocation2] sm:$0xff] %vm216_vm1, %v214_v29 }
  0xf2   :  { %299 = shalt.err (!%p296_p4)
}
  0xf3   :  { %s311_s3 = smov 128   ;;  %s312_s16 = smov 8  }
  0xf4   :  { %230 = dma.vmem_to_hbm [thread:$0]  %s225_s14, 256, %s391_s5, [#allocation3], %s311_s3, %s311_s3, %s312_s16  }
  0xf5   :  { %308 = dma.done.wait [#allocation3], 256  }
  0xf6   :  { %309 = vsyncadd [#allocation3], 4294967040 }
  0xf7   :  { %234 = vsyncpa [#allocation3], 1 }

</bundles_post_ra>
